<compile_context>
chip_gen: v5e
topology: v5e:2x2
jax: 0.10.0
libtpu: 0.0.40
codegen_flags: <defaults>
</compile_context>

<pallas_src>
import math
from functools import partial

import jax
import jax.numpy as jnp
from jax import lax
from jax.experimental import pallas as pl
from jax.experimental.pallas import tpu as pltpu


_LANE = 128
_NEG_BIAS = -1e30  # additive mask bias: exp() underflows to exactly 0, no inf-inf NaNs


def _round_up(x, m):
    return ((x + m - 1) // m) * m


def _pick_tile(total, target):
    """Largest 128-multiple tile dividing `total`, <= target.  If `total` is not a
    multiple of 128, return the full extent (legal: block dim == full array dim)."""
    if total % _LANE:
        return total
    t = max(_LANE, (min(total, target) // _LANE) * _LANE)
    while total % t:
        t -= _LANE
    return t


def _clamp_vmem(nbytes):
    """2x headroom over the estimated block footprint, clamped to [24 MiB, 64 MiB]
    (64 MiB = v7x physical VMEM per TensorCore)."""
    return int(min(max(2 * nbytes, 24 * 1024 * 1024), 64 * 1024 * 1024))


def _erf(x):
    # Abramowitz & Stegun 7.1.26 rational approximation, |err| < 1.5e-7 (f32-accurate).
    # TODO(synk): switch to lax.erf once the erf primitive has a Mosaic TPU lowering.
    a1, a2, a3, a4, a5 = 0.254829592, -0.284496736, 1.421413741, -1.453152027, 1.061405429
    p = 0.3275911
    sign = jnp.where(x >= 0.0, 1.0, -1.0)
    ax = jnp.abs(x)
    t = 1.0 / (1.0 + p * ax)
    poly = ((((a5 * t + a4) * t + a3) * t + a2) * t + a1) * t
    return sign * (1.0 - poly * jnp.exp(-ax * ax))


def _gelu_exact(x):
    # nn.GELU() default = exact (erf) GELU.
    return 0.5 * x * (1.0 + _erf(x * (1.0 / math.sqrt(2.0))))


# ----------------------- fused Q/K/V projection kernels -----------------------

def _proj_shared_kernel(x_ref, w_ref, b_ref, q_out, k_out, v_out, *, dk, mm_dtype):
    # Self-attention path (v is qk): one activation read, one stacked [3dk, D] dot.
    x = x_ref[0].astype(mm_dtype)                                     # [D, TS]
    y = jnp.dot(w_ref[...], x, preferred_element_type=jnp.float32) + b_ref[...]
    q_out[0] = y[:dk].astype(q_out.dtype)
    k_out[0] = y[dk:2 * dk].astype(k_out.dtype)
    v_out[0] = y[2 * dk:].astype(v_out.dtype)


def _proj_split_kernel(qk_ref, v_ref, wqk_ref, bqk_ref, wv_ref, bv_ref,
                       q_out, k_out, v_out, *, dk, mm_dtype):
    x = qk_ref[0].astype(mm_dtype)                                    # [D, TS]
    y = jnp.dot(wqk_ref[...], x, preferred_element_type=jnp.float32) + bqk_ref[...]
    q_out[0] = y[:dk].astype(q_out.dtype)
    k_out[0] = y[dk:].astype(k_out.dtype)
    xv = v_ref[0].astype(mm_dtype)
    yv = jnp.dot(wv_ref[...], xv, preferred_element_type=jnp.float32) + bv_ref[...]
    v_out[0] = yv.astype(v_out.dtype)


def fused_qkv_projection(qk, v, prepped, *, mm_dtype=jnp.bfloat16):
    """1x1 Conv1d projections for Q, K, V in a single pallas_call.

    qk: [B, D, S_pp]; v: [B, D, S_pp] or None (shared with qk).
    Returns (q, k, v) each [B, dk, S_pp] in mm_dtype (q pre-scaled by 1/sqrt(dh))."""
    B, D, S_pp = qk.shape
    dk = prepped["w_v"].shape[0]
    TS = _pick_tile(S_pp, 512)          # 512 lanes ~ HBM roofline, fits v5e's 16 MiB default
    wb = jnp.dtype(mm_dtype).itemsize
    in_bytes = D * TS * jnp.dtype(qk.dtype).itemsize
    out_bytes = 3 * dk * TS * wb

    out_sds = jax.ShapeDtypeStruct((B, dk, S_pp), mm_dtype)
    out_specs = tuple(pl.BlockSpec((1, dk, TS), lambda b_, s: (b_, 0, s)) for _ in range(3))
    grid = (B, S_pp // TS)

    if v is None:
        w = jnp.concatenate([prepped["w_q"], prepped["w_k"], prepped["w_v"]], 0).astype(mm_dtype)
        b = jnp.concatenate([prepped["b_q"], prepped["b_k"], prepped["b_v"]], 0)
        need = 2 * (in_bytes + out_bytes) + w.size * wb + b.size * 4
        return pl.pallas_call(
            partial(_proj_shared_kernel, dk=dk, mm_dtype=mm_dtype),
            out_shape=(out_sds,) * 3,
            grid=grid,
            in_specs=[
                pl.BlockSpec((1, D, TS), lambda b_, s: (b_, 0, s)),
                pl.BlockSpec((3 * dk, D), lambda b_, s: (0, 0)),
                pl.BlockSpec((3 * dk, 1), lambda b_, s: (0, 0)),
            ],
            out_specs=out_specs,
            compiler_params=pltpu.CompilerParams(
                dimension_semantics=("parallel", "parallel"),
                vmem_limit_bytes=_clamp_vmem(need)),
        )(qk, w, b)

    w_qk = jnp.concatenate([prepped["w_q"], prepped["w_k"]], 0).astype(mm_dtype)
    b_qk = jnp.concatenate([prepped["b_q"], prepped["b_k"]], 0)
    w_v = prepped["w_v"].astype(mm_dtype)
    b_v = prepped["b_v"]
    need = 2 * (2 * in_bytes + out_bytes) + (w_qk.size + w_v.size) * wb + (b_qk.size + b_v.size) * 4
    return pl.pallas_call(
        partial(_proj_split_kernel, dk=dk, mm_dtype=mm_dtype),
        out_shape=(out_sds,) * 3,
        grid=grid,
        in_specs=[
            pl.BlockSpec((1, D, TS), lambda b_, s: (b_, 0, s)),
            pl.BlockSpec((1, D, TS), lambda b_, s: (b_, 0, s)),
            pl.BlockSpec((2 * dk, D), lambda b_, s: (0, 0)),
            pl.BlockSpec((2 * dk, 1), lambda b_, s: (0, 0)),
            pl.BlockSpec((dk, D), lambda b_, s: (0, 0)),
            pl.BlockSpec((dk, 1), lambda b_, s: (0, 0)),
        ],
        out_specs=out_specs,
        compiler_params=pltpu.CompilerParams(
            dimension_semantics=("parallel", "parallel"),
            vmem_limit_bytes=_clamp_vmem(need)),
    )(qk, v, w_qk, b_qk, w_v, b_v)


# ------------- attention + out_mask + GELU + output-projection kernel ---------

def _mha_outproj_kernel(q_ref, k_ref, v_ref, bias_ref, wo_ref, bo_ref, o_ref, z_ref,
                        *, num_heads, mm_dtype):
    # Blocks (channels-first, lane dim = patches):
    #   q_ref: (1, H, dh, TQ)      query tile
    #   k_ref, v_ref: (1, H, dh, N)  all keys/values for this patch-batch (resident)
    #   bias_ref: (1, N, H) f32     additive key-mask bias: 0.0 attend / -1e30 masked
    #   wo_ref: (D, dk) mm_dtype, bo_ref: (D, 1) f32
    #   o_ref: (1, D, TQ) f32;  z_ref: (dk, TQ) f32 VMEM scratch (combined heads)
    dh = q_ref.shape[2]
    for h in range(num_heads):                            # static unroll over heads
        qh = q_ref[0, h]                                  # [dh, TQ] (scale folded in w_q)
        kh = k_ref[0, h]                                  # [dh, N]
        vh = v_ref[0, h]                                  # [dh, N]
        bh = bias_ref[0, :, h:h + 1]                      # [N, 1]

        # scores oriented [keys, queries]: softmax stats come out [1, TQ],
        # broadcast-ready against the [dh, TQ] head output, and P@V is a plain NN matmul.
        s = lax.dot_general(kh, qh, (((0,), (0,)), ((), ())),
                            preferred_element_type=jnp.float32)       # [N, TQ]
        s = s + bh                                                     # additive mask bias
        s_max = jnp.max(s, axis=0, keepdims=True)                      # [1, TQ]
        p = jnp.exp(s - s_max)                                         # unnormalized
        denom = jnp.sum(p, axis=0, keepdims=True)                      # [1, TQ] (>= 1)

        yh = lax.dot_general(vh, p.astype(mm_dtype), (((1,), (0,)), ((), ())),
                             preferred_element_type=jnp.float32)       # [dh, TQ]

        # Deferred softmax normalization (EUP reciprocal, dh*TQ mults instead of N*TQ
        # divides), fused with the PyTorch out_mask zeroing of fully-masked heads.
        head_valid = jnp.max(bh, axis=0, keepdims=True) > -1.0         # [1, 1]
        scale = jnp.where(head_valid, pl.reciprocal(denom, approx=True), 0.0)  # [1, TQ]
        z_ref[h * dh:(h + 1) * dh, :] = yh * scale

    g = _gelu_exact(z_ref[...])                           # out_proj = Sequential(GELU, Conv1d)
    out = jnp.dot(wo_ref[...], g.astype(mm_dtype),
                  preferred_element_type=jnp.float32) + bo_ref[...]    # [D, TQ]
    o_ref[0] = out.astype(o_ref.dtype)


def mha_attention_outproj(q, k, v, bias, w_o, b_o, *, num_heads, mm_dtype=jnp.bfloat16):
    """q, k, v: [BG, H, dh, N_pad]; bias: [BG, N_pad, H] f32 (0 / -1e30);
    w_o: [D, dk] f32, b_o: [D, 1] f32.  Returns [BG, D, N_pad] f32."""
    BG, H, dh, N_pad = q.shape
    assert H == num_heads
    dk = H * dh
    D = w_o.shape[0]
    TQ = _pick_tile(N_pad, 256)   # query tiling bounds the N x TQ score tile in VMEM
    # TODO(synk): add key-axis tiling (online softmax) if dk*N_pad K/V blocks ever
    #             outgrow v7x's 64 MiB/TC even in bf16.
    w_o = w_o.astype(mm_dtype)

    it = jnp.dtype(mm_dtype).itemsize
    need = (2 * (dk * TQ * it            # q tile (double-buffered)
                 + 2 * dk * N_pad * it   # resident K + V
                 + N_pad * H * 4         # bias
                 + D * TQ * 4)           # output tile
            + dk * TQ * 4                # z scratch
            + 3 * N_pad * TQ * 4         # score / p temporaries
            + D * dk * it + D * 4)

    flops = 4 * BG * dk * N_pad * N_pad + 2 * BG * D * dk * N_pad
    transcendentals = BG * H * N_pad * N_pad + BG * dk * N_pad
    bytes_accessed = (3 * BG * dk * N_pad * it + BG * N_pad * H * 4
                      + 4 * BG * D * N_pad + D * dk * it + 4 * D)

    kern = partial(_mha_outproj_kernel, num_heads=H, mm_dtype=mm_dtype)
    return pl.pallas_call(
        kern,
        out_shape=jax.ShapeDtypeStruct((BG, D, N_pad), jnp.float32),
        grid=(BG, N_pad // TQ),
        in_specs=[
            pl.BlockSpec((1, H, dh, TQ), lambda b, t: (b, 0, 0, t)),       # q tile
            pl.BlockSpec((1, H, dh, N_pad), lambda b, t: (b, 0, 0, 0)),    # all keys
            pl.BlockSpec((1, H, dh, N_pad), lambda b, t: (b, 0, 0, 0)),    # all values
            pl.BlockSpec((1, N_pad, H), lambda b, t: (b, 0, 0)),           # mask bias
            pl.BlockSpec((D, dk), lambda b, t: (0, 0)),
            pl.BlockSpec((D, 1), lambda b, t: (0, 0)),
        ],
        out_specs=pl.BlockSpec((1, D, TQ), lambda b, t: (b, 0, t)),
        scratch_shapes=[pltpu.VMEM((dk, TQ), jnp.float32)],
        compiler_params=pltpu.CompilerParams(
            # "arbitrary" on the query-tile axis: v7x megacore only shards BG, so the
            # (b,0,0,0)-indexed K/V blocks stay resident per core across query tiles.
            dimension_semantics=("parallel", "arbitrary"),
            vmem_limit_bytes=_clamp_vmem(need)),
        cost_estimate=pl.CostEstimate(flops=flops,
                                      transcendentals=transcendentals,
                                      bytes_accessed=bytes_accessed),
    )(q, k, v, bias, w_o, b_o)


# ------------------------------- parameters -----------------------------------

def init_params(key, model_dim):
    """Deterministic Conv1d-style init (uniform +-1/sqrt(fan_in)); separate q/k/v weights."""
    dk = model_dim // 2
    ks = jax.random.split(key, 8)

    def u(k, shape, fan_in):
        bound = 1.0 / math.sqrt(fan_in)
        return jax.random.uniform(k, shape, jnp.float32, -bound, bound)

    return {
        "w_q": u(ks[0], (dk, model_dim), model_dim), "b_q": u(ks[1], (dk,), model_dim),
        "w_k": u(ks[2], (dk, model_dim), model_dim), "b_k": u(ks[3], (dk,), model_dim),
        "w_v": u(ks[4], (dk, model_dim), model_dim), "b_v": u(ks[5], (dk,), model_dim),
        "w_o": u(ks[6], (model_dim, dk), dk),        "b_o": u(ks[7], (model_dim,), dk),
    }


def prepare_params(params, num_heads):
    """One-time transform: fold 1/sqrt(dh) into the q projection, biases to [*, 1]."""
    dk = params["w_q"].shape[0]
    dh = dk // num_heads
    scale = 1.0 / math.sqrt(dh)
    return {
        "w_q": params["w_q"] * scale, "b_q": (params["b_q"] * scale).reshape(dk, 1),
        "w_k": params["w_k"],         "b_k": params["b_k"].reshape(dk, 1),
        "w_v": params["w_v"],         "b_v": params["b_v"].reshape(dk, 1),
        "w_o": params["w_o"],         "b_o": params["b_o"].reshape(-1, 1),
    }


# ----------------------------- full forward pass ------------------------------

def ltcontext_attention(prepped, qk, v=None, masks=None, *, long_term_attn_g, num_heads,
                        mm_dtype=jnp.bfloat16):
    """LTContextAttention.forward (eval mode, use_separate_proj_weight=True, bias=True)."""
    B, D, S = qk.shape
    G = long_term_attn_g
    H = num_heads
    dk = D // 2
    dh = dk // H

    # Patch-axis padding policy: N = ceil(S/G) patches per strided group.  Pad to a
    # lane multiple only when the waste is small or N is large enough that the query
    # axis must be tiled (attention work scales as N_pad^2); otherwise use full-extent
    # (unpadded) blocks and accept masked stores.
    N = -(-S // G)
    N128 = _round_up(N, _LANE)
    N_pad = N128 if (N128 == N or N >= 1024 or (N128 - N) * 4 <= N) else N
    S_need = N_pad * G                      # sequence length consumed by patchify
    S_pp = _round_up(S_need, _LANE)         # lane-dense length for the projection

    qk_p = jnp.pad(qk, ((0, 0), (0, 0), (0, S_pp - S)))
    v_p = None if v is None else jnp.pad(v, ((0, 0), (0, 0), (0, S_pp - S)))

    # Fused Q/K/V 1x1-conv projections (bf16 outputs) on the un-patched layout.  The
    # 1x1 conv commutes with the patch permutation and projecting zero-padding
    # reproduces the reference's pad-then-project bias values exactly.
    q_f, k_f, v_f = fused_qkv_projection(qk_p, v_p, prepped, mm_dtype=mm_dtype)

    # Patchify: [B, dk, S_need] -> [B*G, H, dh, N_pad] (done on bf16 -> half the
    # transpose HBM traffic).
    # TODO(synk): fold this permutation into the projection out_specs / attention
    #             in_specs (strided lane DMA) to remove the XLA transpose round trips.
    def to_patches(x):
        t = x[:, :, :S_need].reshape(B, dk, N_pad, G)
        return t.transpose(0, 3, 1, 2).reshape(B * G, H, dh, N_pad)

    q_pt, k_pt, v_pt = to_patches(q_f), to_patches(k_f), to_patches(v_f)

    # Key mask -> additive bias.  torch quirk: att_mask.repeat(num_heads,1,1) combined
    # with batch-major head flattening (flat j = bg*H + h) means head h of patch-batch
    # bg uses the key mask of patch-batch (bg*H + h) % BG.
    masks_b = jnp.ones((B, 1, S), dtype=bool) if masks is None else masks
    masks_p = jnp.pad(masks_b, ((0, 0), (0, 0), (0, S_need - S)), constant_values=False)
    key_mask = masks_p.reshape(B, N_pad, G).transpose(0, 2, 1).reshape(B * G, N_pad)
    BG = B * G
    idx = (jnp.arange(BG)[:, None] * H + jnp.arange(H)[None, :]) % BG
    bias = jnp.where(key_mask[idx], 0.0, _NEG_BIAS).astype(jnp.float32)   # [BG, H, N_pad]
    bias = bias.transpose(0, 2, 1)                                        # [BG, N_pad, H]

    # Attention + per-head out_mask + GELU + output projection, fully fused.
    out_full = mha_attention_outproj(q_pt, k_pt, v_pt, bias,
                                     prepped["w_o"], prepped["b_o"],
                                     num_heads=H, mm_dtype=mm_dtype)      # [BG, D, N_pad] f32

    # _undo_reshape: '(b w) d n -> b d (w n)', crop to seq_len.
    out = out_full[:, :, :N].reshape(B, G, D, N).transpose(0, 2, 1, 3).reshape(B, D, G * N)
    out = out[:, :, :S]
    if masks is not None:
        out = out * masks.astype(out.dtype)
    return out


# ------------------------------------ main ------------------------------------

if __name__ == "__main__":
    B, D, S = 2, 32, 19        # batch, model_dim, seq_len (S not multiple of G -> padding path)
    G = 4                      # long_term_attn_g
    H = 2                      # num_heads

    key = jax.random.PRNGKey(0)
    k_qk, k_v, k_p = jax.random.split(key, 3)
    qk = jax.random.normal(k_qk, (B, D, S), jnp.float32)
    v = jax.random.normal(k_v, (B, D, S), jnp.float32)
    masks = jnp.ones((B, 1, S), dtype=bool)
    masks = masks.at[1, :, 2:].set(False)     # exercises fully-masked strided groups

    params = prepare_params(init_params(k_p, D), num_heads=H)
    fwd = jax.jit(partial(ltcontext_attention, long_term_attn_g=G, num_heads=H))

    # cross-attention value path (split q/k + v projection), with masks
    out = jax.block_until_ready(fwd(params, qk, v, masks))
    assert out.shape == (B, D, S), out.shape
    assert bool(jnp.all(jnp.isfinite(out)))

    # self-attention path (v is None, masks is None): single-stream fused projection
    out2 = jax.block_until_ready(fwd(params, qk, None, None))
    assert out2.shape == (B, D, S), out2.shape
    assert bool(jnp.all(jnp.isfinite(out2)))

    print("KERNEL_OK")
</pallas_src>

<mosaic_0001>
module attributes {stable_mosaic.version = 11 : i64} {
  func.func @_proj_split_kernel(%arg0: i32, %arg1: i32, %arg2: memref<1x32x128xf32, #tpu.memory_space<vmem>>, %arg3: memref<1x32x128xf32, #tpu.memory_space<vmem>>, %arg4: memref<32x32xbf16, #tpu.memory_space<vmem>>, %arg5: memref<32x1xf32, #tpu.memory_space<vmem>>, %arg6: memref<16x32xbf16, #tpu.memory_space<vmem>>, %arg7: memref<16x1xf32, #tpu.memory_space<vmem>>, %arg8: memref<1x16x128xbf16, #tpu.memory_space<vmem>>, %arg9: memref<1x16x128xbf16, #tpu.memory_space<vmem>>, %arg10: memref<1x16x128xbf16, #tpu.memory_space<vmem>>) attributes {dimension_semantics = [#tpu.dimension_semantics<parallel>, #tpu.dimension_semantics<parallel>], iteration_bounds = array<i64: 2, 1>, scalar_prefetch = 0 : i64, scratch_operands = 0 : i64, tpu.core_type = #tpu.core_type<tc>, window_params = [{transform_indices = @transform_0, window_bounds = array<i64: 1, 32, 128>}, {transform_indices = @transform_1, window_bounds = array<i64: 1, 32, 128>}, {pipeline_mode = #tpu.pipeline_mode<synchronous>, transform_indices = @transform_2, window_bounds = array<i64: 32, 32>}, {pipeline_mode = #tpu.pipeline_mode<synchronous>, transform_indices = @transform_3, window_bounds = array<i64: 32, 1>}, {pipeline_mode = #tpu.pipeline_mode<synchronous>, transform_indices = @transform_4, window_bounds = array<i64: 16, 32>}, {pipeline_mode = #tpu.pipeline_mode<synchronous>, transform_indices = @transform_5, window_bounds = array<i64: 16, 1>}, {transform_indices = @transform_6, window_bounds = array<i64: 1, 16, 128>}, {transform_indices = @transform_7, window_bounds = array<i64: 1, 16, 128>}, {transform_indices = @transform_8, window_bounds = array<i64: 1, 16, 128>}]} {
    %c0 = arith.constant 0 : index
    %c0_0 = arith.constant 0 : index
    %c0_1 = arith.constant 0 : index
    %0 = vector.load %arg2[%c0, %c0_0, %c0_1] : memref<1x32x128xf32, #tpu.memory_space<vmem>>, vector<1x32x128xf32>
    %1 = vector.shape_cast %0 : vector<1x32x128xf32> to vector<32x128xf32>
    %2 = arith.truncf %1 : vector<32x128xf32> to vector<32x128xbf16>
    %c0_2 = arith.constant 0 : index
    %c0_3 = arith.constant 0 : index
    %3 = vector.load %arg4[%c0_2, %c0_3] : memref<32x32xbf16, #tpu.memory_space<vmem>>, vector<32x32xbf16>
    %cst = arith.constant dense<0.000000e+00> : vector<32x128xf32>
    %4 = tpu.matmul %3, %2, %cst {dimension_numbers = #tpu.dot_dimension_numbers<[1], [0], [0], [1], [0, 0, 1, 1], [], []>} : vector<32x32xbf16>, vector<32x128xbf16>, vector<32x128xf32> -> vector<32x128xf32>
    %c0_4 = arith.constant 0 : index
    %c0_5 = arith.constant 0 : index
    %5 = vector.load %arg5[%c0_4, %c0_5] : memref<32x1xf32, #tpu.memory_space<vmem>>, vector<32x1xf32>
    %6 = vector.broadcast %5 : vector<32x1xf32> to vector<32x128xf32>
    %7 = arith.addf %4, %6 : vector<32x128xf32>
    %8 = vector.extract_strided_slice %7 {offsets = [0, 0], sizes = [16, 128], strides = [1, 1]} : vector<32x128xf32> to vector<16x128xf32>
    %9 = arith.truncf %8 : vector<16x128xf32> to vector<16x128xbf16>
    %c0_6 = arith.constant 0 : index
    %c0_7 = arith.constant 0 : index
    %c0_8 = arith.constant 0 : index
    %10 = vector.load %arg8[%c0_6, %c0_7, %c0_8] : memref<1x16x128xbf16, #tpu.memory_space<vmem>>, vector<1x16x128xbf16>
    %11 = vector.shape_cast %10 : vector<1x16x128xbf16> to vector<16x128xbf16>
    %12 = vector.shape_cast %9 : vector<16x128xbf16> to vector<1x16x128xbf16>
    tpu.vector_store %arg8[%c0_6, %c0_7, %c0_8], %12 {strides = array<i32>} : memref<1x16x128xbf16, #tpu.memory_space<vmem>>, vector<1x16x128xbf16>,
    %13 = vector.extract_strided_slice %7 {offsets = [16, 0], sizes = [16, 128], strides = [1, 1]} : vector<32x128xf32> to vector<16x128xf32>
    %14 = arith.truncf %13 : vector<16x128xf32> to vector<16x128xbf16>
    %c0_9 = arith.constant 0 : index
    %c0_10 = arith.constant 0 : index
    %c0_11 = arith.constant 0 : index
    %15 = vector.load %arg9[%c0_9, %c0_10, %c0_11] : memref<1x16x128xbf16, #tpu.memory_space<vmem>>, vector<1x16x128xbf16>
    %16 = vector.shape_cast %15 : vector<1x16x128xbf16> to vector<16x128xbf16>
    %17 = vector.shape_cast %14 : vector<16x128xbf16> to vector<1x16x128xbf16>
    tpu.vector_store %arg9[%c0_9, %c0_10, %c0_11], %17 {strides = array<i32>} : memref<1x16x128xbf16, #tpu.memory_space<vmem>>, vector<1x16x128xbf16>,
    %c0_12 = arith.constant 0 : index
    %c0_13 = arith.constant 0 : index
    %c0_14 = arith.constant 0 : index
    %18 = vector.load %arg3[%c0_12, %c0_13, %c0_14] : memref<1x32x128xf32, #tpu.memory_space<vmem>>, vector<1x32x128xf32>
    %19 = vector.shape_cast %18 : vector<1x32x128xf32> to vector<32x128xf32>
    %20 = arith.truncf %19 : vector<32x128xf32> to vector<32x128xbf16>
    %c0_15 = arith.constant 0 : index
    %c0_16 = arith.constant 0 : index
    %21 = vector.load %arg6[%c0_15, %c0_16] : memref<16x32xbf16, #tpu.memory_space<vmem>>, vector<16x32xbf16>
    %cst_17 = arith.constant dense<0.000000e+00> : vector<16x128xf32>
    %22 = tpu.matmul %21, %20, %cst_17 {dimension_numbers = #tpu.dot_dimension_numbers<[1], [0], [0], [1], [0, 0, 1, 1], [], []>} : vector<16x32xbf16>, vector<32x128xbf16>, vector<16x128xf32> -> vector<16x128xf32>
    %c0_18 = arith.constant 0 : index
    %c0_19 = arith.constant 0 : index
    %23 = vector.load %arg7[%c0_18, %c0_19] : memref<16x1xf32, #tpu.memory_space<vmem>>, vector<16x1xf32>
    %24 = vector.broadcast %23 : vector<16x1xf32> to vector<16x128xf32>
    %25 = arith.addf %22, %24 : vector<16x128xf32>
    %26 = arith.truncf %25 : vector<16x128xf32> to vector<16x128xbf16>
    %c0_20 = arith.constant 0 : index
    %c0_21 = arith.constant 0 : index
    %c0_22 = arith.constant 0 : index
    %27 = vector.load %arg10[%c0_20, %c0_21, %c0_22] : memref<1x16x128xbf16, #tpu.memory_space<vmem>>, vector<1x16x128xbf16>
    %28 = vector.shape_cast %27 : vector<1x16x128xbf16> to vector<16x128xbf16>
    %29 = vector.shape_cast %26 : vector<16x128xbf16> to vector<1x16x128xbf16>
    tpu.vector_store %arg10[%c0_20, %c0_21, %c0_22], %29 {strides = array<i32>} : memref<1x16x128xbf16, #tpu.memory_space<vmem>>, vector<1x16x128xbf16>,
    return
  }
  func.func @transform_0(%arg0: i32, %arg1: i32) -> (i32, i32, i32) {
    %c0_i32 = arith.constant 0 : i32
    %c0_i32_0 = arith.constant 0 : i32
    return %arg0, %c0_i32, %arg1 : i32, i32, i32
  }
  func.func @transform_1(%arg0: i32, %arg1: i32) -> (i32, i32, i32) {
    %c0_i32 = arith.constant 0 : i32
    %c0_i32_0 = arith.constant 0 : i32
    return %arg0, %c0_i32, %arg1 : i32, i32, i32
  }
  func.func @transform_2(%arg0: i32, %arg1: i32) -> (i32, i32) {
    %c0_i32 = arith.constant 0 : i32
    %c0_i32_0 = arith.constant 0 : i32
    %c0_i32_1 = arith.constant 0 : i32
    return %c0_i32, %c0_i32_0 : i32, i32
  }
  func.func @transform_3(%arg0: i32, %arg1: i32) -> (i32, i32) {
    %c0_i32 = arith.constant 0 : i32
    %c0_i32_0 = arith.constant 0 : i32
    %c0_i32_1 = arith.constant 0 : i32
    return %c0_i32, %c0_i32_0 : i32, i32
  }
  func.func @transform_4(%arg0: i32, %arg1: i32) -> (i32, i32) {
    %c0_i32 = arith.constant 0 : i32
    %c0_i32_0 = arith.constant 0 : i32
    %c0_i32_1 = arith.constant 0 : i32
    return %c0_i32, %c0_i32_0 : i32, i32
  }
  func.func @transform_5(%arg0: i32, %arg1: i32) -> (i32, i32) {
    %c0_i32 = arith.constant 0 : i32
    %c0_i32_0 = arith.constant 0 : i32
    %c0_i32_1 = arith.constant 0 : i32
    return %c0_i32, %c0_i32_0 : i32, i32
  }
  func.func @transform_6(%arg0: i32, %arg1: i32) -> (i32, i32, i32) {
    %c0_i32 = arith.constant 0 : i32
    %c0_i32_0 = arith.constant 0 : i32
    return %arg0, %c0_i32, %arg1 : i32, i32, i32
  }
  func.func @transform_7(%arg0: i32, %arg1: i32) -> (i32, i32, i32) {
    %c0_i32 = arith.constant 0 : i32
    %c0_i32_0 = arith.constant 0 : i32
    return %arg0, %c0_i32, %arg1 : i32, i32, i32
  }
  func.func @transform_8(%arg0: i32, %arg1: i32) -> (i32, i32, i32) {
    %c0_i32 = arith.constant 0 : i32
    %c0_i32_0 = arith.constant 0 : i32
    return %arg0, %c0_i32, %arg1 : i32, i32, i32
  }
}

module attributes {stable_mosaic.version = 11 : i64} {
  func.func @_mha_outproj_kernel(%arg0: i32, %arg1: i32, %arg2: memref<1x2x8x5xbf16, #tpu.memory_space<vmem>>, %arg3: memref<1x2x8x5xbf16, #tpu.memory_space<vmem>>, %arg4: memref<1x2x8x5xbf16, #tpu.memory_space<vmem>>, %arg5: memref<1x5x2xf32, #tpu.memory_space<vmem>>, %arg6: memref<32x16xbf16, #tpu.memory_space<vmem>>, %arg7: memref<32x1xf32, #tpu.memory_space<vmem>>, %arg8: memref<1x32x5xf32, #tpu.memory_space<vmem>>, %arg9: memref<16x5xf32, #tpu.memory_space<vmem>>) attributes {dimension_semantics = [#tpu.dimension_semantics<parallel>, #tpu.dimension_semantics<arbitrary>], iteration_bounds = array<i64: 8, 1>, scalar_prefetch = 0 : i64, scratch_operands = 1 : i64, tpu.core_type = #tpu.core_type<tc>, window_params = [{transform_indices = @transform_0, window_bounds = array<i64: 1, 2, 8, 5>}, {transform_indices = @transform_1, window_bounds = array<i64: 1, 2, 8, 5>}, {transform_indices = @transform_2, window_bounds = array<i64: 1, 2, 8, 5>}, {transform_indices = @transform_3, window_bounds = array<i64: 1, 5, 2>}, {pipeline_mode = #tpu.pipeline_mode<synchronous>, transform_indices = @transform_4, window_bounds = array<i64: 32, 16>}, {pipeline_mode = #tpu.pipeline_mode<synchronous>, transform_indices = @transform_5, window_bounds = array<i64: 32, 1>}, {transform_indices = @transform_6, window_bounds = array<i64: 1, 32, 5>}]} {
    %c0 = arith.constant 0 : index
    %c0_0 = arith.constant 0 : index
    %c0_1 = arith.constant 0 : index
    %c0_2 = arith.constant 0 : index
    %0 = vector.load %arg2[%c0, %c0_0, %c0_1, %c0_2] : memref<1x2x8x5xbf16, #tpu.memory_space<vmem>>, vector<1x1x8x5xbf16>
    %1 = vector.shape_cast %0 : vector<1x1x8x5xbf16> to vector<8x5xbf16>
    %c0_3 = arith.constant 0 : index
    %c0_4 = arith.constant 0 : index
    %c0_5 = arith.constant 0 : index
    %c0_6 = arith.constant 0 : index
    %2 = vector.load %arg3[%c0_3, %c0_4, %c0_5, %c0_6] : memref<1x2x8x5xbf16, #tpu.memory_space<vmem>>, vector<1x1x8x5xbf16>
    %3 = vector.shape_cast %2 : vector<1x1x8x5xbf16> to vector<8x5xbf16>
    %c0_7 = arith.constant 0 : index
    %c0_8 = arith.constant 0 : index
    %c0_9 = arith.constant 0 : index
    %c0_10 = arith.constant 0 : index
    %4 = vector.load %arg4[%c0_7, %c0_8, %c0_9, %c0_10] : memref<1x2x8x5xbf16, #tpu.memory_space<vmem>>, vector<1x1x8x5xbf16>
    %5 = vector.shape_cast %4 : vector<1x1x8x5xbf16> to vector<8x5xbf16>
    %c0_11 = arith.constant 0 : index
    %c0_12 = arith.constant 0 : index
    %c0_13 = arith.constant 0 : index
    %6 = vector.load %arg5[%c0_11, %c0_12, %c0_13] : memref<1x5x2xf32, #tpu.memory_space<vmem>>, vector<1x5x1xf32>
    %7 = vector.shape_cast %6 : vector<1x5x1xf32> to vector<5x1xf32>
    %cst = arith.constant dense<0.000000e+00> : vector<5x5xf32>
    %8 = tpu.matmul %3, %1, %cst {dimension_numbers = #tpu.dot_dimension_numbers<[0], [0], [1], [1], [0, 1, 1, 1], [], []>} : vector<8x5xbf16>, vector<8x5xbf16>, vector<5x5xf32> -> vector<5x5xf32>
    %9 = vector.broadcast %7 : vector<5x1xf32> to vector<5x5xf32>
    %10 = arith.addf %8, %9 : vector<5x5xf32>
    %cst_14 = arith.constant dense<0xFF800000> : vector<5xf32>
    %11 = vector.multi_reduction <maximumf>, %10, %cst_14 [0] : vector<5x5xf32> to vector<5xf32>
    %12 = vector.shape_cast %11 : vector<5xf32> to vector<1x5xf32>
    %13 = vector.broadcast %12 : vector<1x5xf32> to vector<5x5xf32>
    %14 = arith.subf %10, %13 : vector<5x5xf32>
    %15 = math.exp %14 : vector<5x5xf32>
    %cst_15 = arith.constant dense<0.000000e+00> : vector<5xf32>
    %16 = vector.multi_reduction <add>, %15, %cst_15 [0] : vector<5x5xf32> to vector<5xf32>
    %17 = vector.shape_cast %16 : vector<5xf32> to vector<1x5xf32>
    %18 = arith.truncf %15 : vector<5x5xf32> to vector<5x5xbf16>
    %cst_16 = arith.constant dense<0.000000e+00> : vector<8x5xf32>
    %19 = tpu.matmul %5, %18, %cst_16 {dimension_numbers = #tpu.dot_dimension_numbers<[1], [0], [0], [1], [0, 0, 1, 1], [], []>} : vector<8x5xbf16>, vector<5x5xbf16>, vector<8x5xf32> -> vector<8x5xf32>
    %cst_17 = arith.constant dense<0xFF800000> : vector<1xf32>
    %20 = vector.multi_reduction <maximumf>, %7, %cst_17 [0] : vector<5x1xf32> to vector<1xf32>
    %21 = vector.shape_cast %20 : vector<1xf32> to vector<1x1xf32>
    %cst_18 = arith.constant -1.000000e+00 : f32
    %22 = vector.broadcast %cst_18 : f32 to vector<1x1xf32>
    %23 = arith.cmpf ogt, %21, %22 : vector<1x1xf32>
    %24 = tpu.reciprocal %17 {approx = true} : vector<1x5xf32> -> vector<1x5xf32>
    %cst_19 = arith.constant 0.000000e+00 : f32
    %25 = vector.shape_cast %23 : vector<1x1xi1> to vector<1x1xi1>
    %26 = vector.broadcast %25 : vector<1x1xi1> to vector<1x5xi1>
    %27 = vector.broadcast %cst_19 : f32 to vector<1x5xf32>
    %28 = arith.select %26, %24, %27 : vector<1x5xi1>, vector<1x5xf32>
    %29 = vector.broadcast %28 : vector<1x5xf32> to vector<8x5xf32>
    %30 = arith.mulf %19, %29 : vector<8x5xf32>
    %c0_20 = arith.constant 0 : index
    %c0_21 = arith.constant 0 : index
    %31 = vector.load %arg9[%c0_20, %c0_21] : memref<16x5xf32, #tpu.memory_space<vmem>>, vector<8x5xf32>
    tpu.vector_store %arg9[%c0_20, %c0_21], %30 {strides = array<i32>} : memref<16x5xf32, #tpu.memory_space<vmem>>, vector<8x5xf32>,
    %c0_22 = arith.constant 0 : index
    %c1 = arith.constant 1 : index
    %c0_23 = arith.constant 0 : index
    %c0_24 = arith.constant 0 : index
    %32 = vector.load %arg2[%c0_22, %c1, %c0_23, %c0_24] : memref<1x2x8x5xbf16, #tpu.memory_space<vmem>>, vector<1x1x8x5xbf16>
    %33 = vector.shape_cast %32 : vector<1x1x8x5xbf16> to vector<8x5xbf16>
    %c0_25 = arith.constant 0 : index
    %c1_26 = arith.constant 1 : index
    %c0_27 = arith.constant 0 : index
    %c0_28 = arith.constant 0 : index
    %34 = vector.load %arg3[%c0_25, %c1_26, %c0_27, %c0_28] : memref<1x2x8x5xbf16, #tpu.memory_space<vmem>>, vector<1x1x8x5xbf16>
    %35 = vector.shape_cast %34 : vector<1x1x8x5xbf16> to vector<8x5xbf16>
    %c0_29 = arith.constant 0 : index
    %c1_30 = arith.constant 1 : index
    %c0_31 = arith.constant 0 : index
    %c0_32 = arith.constant 0 : index
    %36 = vector.load %arg4[%c0_29, %c1_30, %c0_31, %c0_32] : memref<1x2x8x5xbf16, #tpu.memory_space<vmem>>, vector<1x1x8x5xbf16>
    %37 = vector.shape_cast %36 : vector<1x1x8x5xbf16> to vector<8x5xbf16>
    %c0_33 = arith.constant 0 : index
    %c0_34 = arith.constant 0 : index
    %c1_35 = arith.constant 1 : index
    %38 = vector.load %arg5[%c0_33, %c0_34, %c1_35] : memref<1x5x2xf32, #tpu.memory_space<vmem>>, vector<1x5x1xf32>
    %39 = vector.shape_cast %38 : vector<1x5x1xf32> to vector<5x1xf32>
    %cst_36 = arith.constant dense<0.000000e+00> : vector<5x5xf32>
    %40 = tpu.matmul %35, %33, %cst_36 {dimension_numbers = #tpu.dot_dimension_numbers<[0], [0], [1], [1], [0, 1, 1, 1], [], []>} : vector<8x5xbf16>, vector<8x5xbf16>, vector<5x5xf32> -> vector<5x5xf32>
    %41 = vector.broadcast %39 : vector<5x1xf32> to vector<5x5xf32>
    %42 = arith.addf %40, %41 : vector<5x5xf32>
    %cst_37 = arith.constant dense<0xFF800000> : vector<5xf32>
    %43 = vector.multi_reduction <maximumf>, %42, %cst_37 [0] : vector<5x5xf32> to vector<5xf32>
    %44 = vector.shape_cast %43 : vector<5xf32> to vector<1x5xf32>
    %45 = vector.broadcast %44 : vector<1x5xf32> to vector<5x5xf32>
    %46 = arith.subf %42, %45 : vector<5x5xf32>
    %47 = math.exp %46 : vector<5x5xf32>
    %cst_38 = arith.constant dense<0.000000e+00> : vector<5xf32>
    %48 = vector.multi_reduction <add>, %47, %cst_38 [0] : vector<5x5xf32> to vector<5xf32>
    %49 = vector.shape_cast %48 : vector<5xf32> to vector<1x5xf32>
    %50 = arith.truncf %47 : vector<5x5xf32> to vector<5x5xbf16>
    %cst_39 = arith.constant dense<0.000000e+00> : vector<8x5xf32>
    %51 = tpu.matmul %37, %50, %cst_39 {dimension_numbers = #tpu.dot_dimension_numbers<[1], [0], [0], [1], [0, 0, 1, 1], [], []>} : vector<8x5xbf16>, vector<5x5xbf16>, vector<8x5xf32> -> vector<8x5xf32>
    %cst_40 = arith.constant dense<0xFF800000> : vector<1xf32>
    %52 = vector.multi_reduction <maximumf>, %39, %cst_40 [0] : vector<5x1xf32> to vector<1xf32>
    %53 = vector.shape_cast %52 : vector<1xf32> to vector<1x1xf32>
    %cst_41 = arith.constant -1.000000e+00 : f32
    %54 = vector.broadcast %cst_41 : f32 to vector<1x1xf32>
    %55 = arith.cmpf ogt, %53, %54 : vector<1x1xf32>
    %56 = tpu.reciprocal %49 {approx = true} : vector<1x5xf32> -> vector<1x5xf32>
    %cst_42 = arith.constant 0.000000e+00 : f32
    %57 = vector.shape_cast %55 : vector<1x1xi1> to vector<1x1xi1>
    %58 = vector.broadcast %57 : vector<1x1xi1> to vector<1x5xi1>
    %59 = vector.broadcast %cst_42 : f32 to vector<1x5xf32>
    %60 = arith.select %58, %56, %59 : vector<1x5xi1>, vector<1x5xf32>
    %61 = vector.broadcast %60 : vector<1x5xf32> to vector<8x5xf32>
    %62 = arith.mulf %51, %61 : vector<8x5xf32>
    %c8 = arith.constant 8 : index
    %c0_43 = arith.constant 0 : index
    %63 = vector.load %arg9[%c8, %c0_43] : memref<16x5xf32, #tpu.memory_space<vmem>>, vector<8x5xf32>
    tpu.vector_store %arg9[%c8, %c0_43], %62 {strides = array<i32>} : memref<16x5xf32, #tpu.memory_space<vmem>>, vector<8x5xf32>,
    %c0_44 = arith.constant 0 : index
    %c0_45 = arith.constant 0 : index
    %64 = vector.load %arg9[%c0_44, %c0_45] : memref<16x5xf32, #tpu.memory_space<vmem>>, vector<16x5xf32>
    %cst_46 = arith.constant 5.000000e-01 : f32
    %65 = vector.broadcast %cst_46 : f32 to vector<16x5xf32>
    %66 = arith.mulf %65, %64 : vector<16x5xf32>
    %cst_47 = arith.constant 0.707106769 : f32
    %67 = vector.broadcast %cst_47 : f32 to vector<16x5xf32>
    %68 = arith.mulf %64, %67 : vector<16x5xf32>
    %cst_48 = arith.constant 0.000000e+00 : f32
    %69 = vector.broadcast %cst_48 : f32 to vector<16x5xf32>
    %70 = arith.cmpf oge, %68, %69 : vector<16x5xf32>
    %cst_49 = arith.constant 1.000000e+00 : f32
    %cst_50 = arith.constant -1.000000e+00 : f32
    %71 = vector.broadcast %cst_49 : f32 to vector<16x5xf32>
    %72 = vector.broadcast %cst_50 : f32 to vector<16x5xf32>
    %73 = arith.select %70, %71, %72 : vector<16x5xi1>, vector<16x5xf32>
    %74 = math.absf %68 : vector<16x5xf32>
    %cst_51 = arith.constant 0.327591091 : f32
    %75 = vector.broadcast %cst_51 : f32 to vector<16x5xf32>
    %76 = arith.mulf %75, %74 : vector<16x5xf32>
    %cst_52 = arith.constant 1.000000e+00 : f32
    %77 = vector.broadcast %cst_52 : f32 to vector<16x5xf32>
    %78 = arith.addf %77, %76 : vector<16x5xf32>
    %cst_53 = arith.constant 1.000000e+00 : f32
    %79 = vector.broadcast %cst_53 : f32 to vector<16x5xf32>
    %80 = arith.divf %79, %78 : vector<16x5xf32>
    %cst_54 = arith.constant 1.06140542 : f32
    %81 = vector.broadcast %cst_54 : f32 to vector<16x5xf32>
    %82 = arith.mulf %81, %80 : vector<16x5xf32>
    %cst_55 = arith.constant -1.45315206 : f32
    %83 = vector.broadcast %cst_55 : f32 to vector<16x5xf32>
    %84 = arith.addf %82, %83 : vector<16x5xf32>
    %85 = arith.mulf %84, %80 : vector<16x5xf32>
    %cst_56 = arith.constant 1.42141378 : f32
    %86 = vector.broadcast %cst_56 : f32 to vector<16x5xf32>
    %87 = arith.addf %85, %86 : vector<16x5xf32>
    %88 = arith.mulf %87, %80 : vector<16x5xf32>
    %cst_57 = arith.constant -0.284496725 : f32
    %89 = vector.broadcast %cst_57 : f32 to vector<16x5xf32>
    %90 = arith.addf %88, %89 : vector<16x5xf32>
    %91 = arith.mulf %90, %80 : vector<16x5xf32>
    %cst_58 = arith.constant 0.254829586 : f32
    %92 = vector.broadcast %cst_58 : f32 to vector<16x5xf32>
    %93 = arith.addf %91, %92 : vector<16x5xf32>
    %94 = arith.mulf %93, %80 : vector<16x5xf32>
    %cst_59 = arith.constant 0.000000e+00 : f32
    %95 = vector.broadcast %cst_59 : f32 to vector<16x5xf32>
    %96 = arith.subf %95, %74 : vector<16x5xf32>
    %97 = arith.mulf %96, %74 : vector<16x5xf32>
    %98 = math.exp %97 : vector<16x5xf32>
    %99 = arith.mulf %94, %98 : vector<16x5xf32>
    %cst_60 = arith.constant 1.000000e+00 : f32
    %100 = vector.broadcast %cst_60 : f32 to vector<16x5xf32>
    %101 = arith.subf %100, %99 : vector<16x5xf32>
    %102 = arith.mulf %73, %101 : vector<16x5xf32>
    %cst_61 = arith.constant 1.000000e+00 : f32
    %103 = vector.broadcast %cst_61 : f32 to vector<16x5xf32>
    %104 = arith.addf %103, %102 : vector<16x5xf32>
    %105 = arith.mulf %66, %104 : vector<16x5xf32>
    %c0_62 = arith.constant 0 : index
    %c0_63 = arith.constant 0 : index
    %106 = vector.load %arg6[%c0_62, %c0_63] : memref<32x16xbf16, #tpu.memory_space<vmem>>, vector<32x16xbf16>
    %107 = arith.truncf %105 : vector<16x5xf32> to vector<16x5xbf16>
    %cst_64 = arith.constant dense<0.000000e+00> : vector<32x5xf32>
    %108 = tpu.matmul %106, %107, %cst_64 {dimension_numbers = #tpu.dot_dimension_numbers<[1], [0], [0], [1], [0, 0, 1, 1], [], []>} : vector<32x16xbf16>, vector<16x5xbf16>, vector<32x5xf32> -> vector<32x5xf32>
    %c0_65 = arith.constant 0 : index
    %c0_66 = arith.constant 0 : index
    %109 = vector.load %arg7[%c0_65, %c0_66] : memref<32x1xf32, #tpu.memory_space<vmem>>, vector<32x1xf32>
    %110 = vector.broadcast %109 : vector<32x1xf32> to vector<32x5xf32>
    %111 = arith.addf %108, %110 : vector<32x5xf32>
    %c0_67 = arith.constant 0 : index
    %c0_68 = arith.constant 0 : index
    %c0_69 = arith.constant 0 : index
    %112 = vector.load %arg8[%c0_67, %c0_68, %c0_69] : memref<1x32x5xf32, #tpu.memory_space<vmem>>, vector<1x32x5xf32>
    %113 = vector.shape_cast %112 : vector<1x32x5xf32> to vector<32x5xf32>
    %114 = vector.shape_cast %111 : vector<32x5xf32> to vector<1x32x5xf32>
    tpu.vector_store %arg8[%c0_67, %c0_68, %c0_69], %114 {strides = array<i32>} : memref<1x32x5xf32, #tpu.memory_space<vmem>>, vector<1x32x5xf32>,
    return
  }
  func.func @transform_0(%arg0: i32, %arg1: i32) -> (i32, i32, i32, i32) {
    %c0_i32 = arith.constant 0 : i32
    %c0_i32_0 = arith.constant 0 : i32
    %c0_i32_1 = arith.constant 0 : i32
    return %arg0, %c0_i32, %c0_i32_0, %arg1 : i32, i32, i32, i32
  }
  func.func @transform_1(%arg0: i32, %arg1: i32) -> (i32, i32, i32, i32) {
    %c0_i32 = arith.constant 0 : i32
    %c0_i32_0 = arith.constant 0 : i32
    %c0_i32_1 = arith.constant 0 : i32
    %c0_i32_2 = arith.constant 0 : i32
    return %arg0, %c0_i32, %c0_i32_0, %c0_i32_1 : i32, i32, i32, i32
  }
  func.func @transform_2(%arg0: i32, %arg1: i32) -> (i32, i32, i32, i32) {
    %c0_i32 = arith.constant 0 : i32
    %c0_i32_0 = arith.constant 0 : i32
    %c0_i32_1 = arith.constant 0 : i32
    %c0_i32_2 = arith.constant 0 : i32
    return %arg0, %c0_i32, %c0_i32_0, %c0_i32_1 : i32, i32, i32, i32
  }
  func.func @transform_3(%arg0: i32, %arg1: i32) -> (i32, i32, i32) {
    %c0_i32 = arith.constant 0 : i32
    %c0_i32_0 = arith.constant 0 : i32
    %c0_i32_1 = arith.constant 0 : i32
    return %arg0, %c0_i32, %c0_i32_0 : i32, i32, i32
  }
  func.func @transform_4(%arg0: i32, %arg1: i32) -> (i32, i32) {
    %c0_i32 = arith.constant 0 : i32
    %c0_i32_0 = arith.constant 0 : i32
    %c0_i32_1 = arith.constant 0 : i32
    return %c0_i32, %c0_i32_0 : i32, i32
  }
  func.func @transform_5(%arg0: i32, %arg1: i32) -> (i32, i32) {
    %c0_i32 = arith.constant 0 : i32
    %c0_i32_0 = arith.constant 0 : i32
    %c0_i32_1 = arith.constant 0 : i32
    return %c0_i32, %c0_i32_0 : i32, i32
  }
  func.func @transform_6(%arg0: i32, %arg1: i32) -> (i32, i32, i32) {
    %c0_i32 = arith.constant 0 : i32
    %c0_i32_0 = arith.constant 0 : i32
    return %arg0, %c0_i32, %arg1 : i32, i32, i32
  }
}

</mosaic_0001>

<bundles_post_ra>
// kernel: ltcontext_attention.2
= control target key start
LH: loop header
LB: loop body
LE: loop exit
PB: predicated region body
PF: predicated region fallthrough
CT: control target
= control target key end

     0   :  { %s884_s27 = smov 0   ;;  %s886_s28 = smov 0   ;;  %s957_s0 = inlined_call_operand.vmem [shape: f32[2,32,128], index: 0, kind: input, shape index: {}]   ;;  %s958_s1 = inlined_call_operand.vmem [shape: f32[2,32,128], index: 1, kind: input, shape index: {}]   ;;  %s959_s2 = inlined_call_operand.vmem [shape: bf16[32,32], index: 2, kind: input, shape index: {}]   ;;  %s960_s3 = inlined_call_operand.vmem [shape: f32[32,1], index: 3, kind: input, shape index: {}]   ;;  %s961_s4 = inlined_call_operand.vmem [shape: bf16[16,32], index: 4, kind: input, shape index: {}]   ;;  %s962_s5 = inlined_call_operand.vmem [shape: f32[16,1], index: 5, kind: input, shape index: {}]   ;;  %s963_s6 = inlined_call_operand.vmem [shape: bf16[2,16,128], index: 6, kind: output, shape index: {0}]   ;;  %s964_s7 = inlined_call_operand.vmem [shape: bf16[2,16,128], index: 7, kind: output, shape index: {1}]   ;;  %s965_s8 = inlined_call_operand.vmem [shape: bf16[2,16,128], index: 8, kind: output, shape index: {2}]  }
   0x1   :  { %s888_s29 = smov 0  }
   0x2 LB: > { %s31_s30 = sadd.s32 1, %s832_s28  ;;  %p733_p0 = scmp.ge.s32.totalorder %s836_s29, 1  ;;  %s836_s29 = sphi %s888_s29, %s19_s29   ;;  %s832_s28 = sphi %s886_s28, %s967_s28   ;;  %s828_s27 = sphi %s884_s27, %s966_s27  }
   0x3   : > { %p33_p1 = scmp.ge.s32.totalorder %s31_s30, 2  ;;  %p305_p2 = scmp.lt.s32.totalorder %s836_s29, 3 }
   0x5   : > { %s969_s30 = smov (%p33_p1, %s31_s30), 0  ;;  %p306_p3 = pnand %p733_p0, %p305_p2 }
   0x6   : > { %p369_p4 = scmp.lt.s32.totalorder (!%p306_p3), %s828_s27, 1 }
   0x7   : > { %309 = sbr.rel (%p306_p3) target bundleno = 171 (0xab), region = 44 }
   0xc   : > { %v838_v0 = vmov 0   ;;  %v422_v1 = vld [vmem:[%s960_s3 + $0x10] sm:$0xff]  ;;  %v420_v2 = vld [vmem:[%s960_s3] sm:$0xff]  ;;  %s971_s27 = smov (!%p369_p4, %s828_s27), 1  ;;  %v423_v4 = vld [vmem:[%s960_s3 + $0x18] sm:$0xff]  ;;  %vm454_vm0 = vcmask 261120  }
   0xd   : > { %812 = vset.pattern.permute.xlu1 %v838_v0  ;;  %811 = vset.pattern.permute.xlu0 %v838_v0  ;;  %v496_v3 = vld [vmem:[%s962_s5] sm:$0xff]  ;;  %s761_s15 = sshll.u32 %s971_s27, 5  ;;  %v421_v15 = vld [vmem:[%s960_s3 + $0x8] sm:$0xff]  ;;  %s763_s16 = sshll.u32 %s971_s27, 3 }
   0xe   : > { %436 = vperm.xlu1 %812, %v422_v1   ;;  %426 = vperm.xlu0 %811, %v420_v2   ;;  %s376_s18 = scalar_lea.vmem %s957_s0, %s761_s15  ;;  %s384_s21 = scalar_lea.vmem %s958_s1, %s761_s15  ;;  %v497_v17 = vld [vmem:[%s962_s5 + $0x8] sm:$0xff]  ;;  %v766_v19 = vld [vmem:[%s959_s2] sm:$0xff] }
   0xf   : > { %813 = vset.pattern.permute.xlu2 %v838_v0  ;;  %v412_v5 = vld [vmem:[%s376_s18 + $0x10] sm:$0xff]  ;;  %v413_v6 = vld [vmem:[%s376_s18 + $0x18] sm:$0xff]  ;;  %v410_v10 = vld [vmem:[%s376_s18] sm:$0xff]  ;;  %s392_s19 = scalar_lea.vmem %s963_s6, %s763_s16  ;;  %s408_s22 = scalar_lea.vmem %s965_s8, %s763_s16 }
  0x10   : > { %500 = vperm.xlu2 %813, %v496_v3   ;;  %v490_v7 = vld [vmem:[%s384_s21 + $0x10] sm:$0xff]  ;;  %v415_v8 = vpack.c.bf16 %v413_v6, %v412_v5  ;;  %v491_v9 = vld [vmem:[%s384_s21 + $0x18] sm:$0xff]  ;;  %v411_v11 = vld [vmem:[%s376_s18 + $0x8] sm:$0xff]  ;;  %s400_s24 = scalar_lea.vmem %s964_s7, %s763_s16 }
  0x11   : > { %v493_v12 = vpack.c.bf16 %v491_v9, %v490_v7  ;;  %v488_v13 = vld [vmem:[%s384_s21] sm:$0xff]  ;;  %v489_v14 = vld [vmem:[%s384_s21 + $0x8] sm:$0xff]  ;;  %v414_v16 = vpack.c.bf16 %v411_v11, %v410_v10 }
  0x12   : > { %467 = vmatpush.bf16.msra.mxu0 %v415_v8  ;;  %784 = vmatpush.bf16.msra.mxu2 %v415_v8  ;;  %v492_v18 = vpack.c.bf16 %v489_v14, %v488_v13  ;;  %v767_v20 = vld [vmem:[%s959_s2 + $0x8] sm:$0xff]  ;;  %v768_v21 = vld [vmem:[%s961_s4] sm:$0xff] }
  0x13   : > { %522 = vmatpush.bf16.msra.mxu1 %v493_v12 }
  0x16   : > { %441 = vperm.xlu1 %812, %v423_v4   ;;  %431 = vperm.xlu0 %811, %v421_v15  }
  0x17   : > { %468 = vmatpush.bf16.msra.mxu0 %v414_v16  ;;  %785 = vmatpush.bf16.msra.mxu2 %v414_v16 }
  0x18   : > { %505 = vperm.xlu2 %813, %v497_v17   ;;  %523 = vmatpush.bf16.msra.mxu1 %v492_v18 }
  0x1a   : > { %752 = vmatmul.msk.bf16.vlgmr.msra.gmra.mxu0 %vm454_vm0, %v766_v19  ;;  %753 = vmatmul.msk.bf16.vlgmr.msra.gmra.mxu2 %vm454_vm0, %v767_v20 }
  0x1b   : > { %758 = vmatmul.msk.bf16.vlgmr.msra.gmra.mxu1 %vm454_vm0, %v768_v21 }
  0x6a   : > { %v501_v23 = vpop.permute.xlu2 %500 }
  0x72   : > { %v506_v31 = vpop.permute.xlu2 %505 }
  0x80   : > { %v427_v22 = vpop.permute.xlu0 %426  ;;  %v437_v26 = vpop.permute.xlu1 %436 }
  0x88   : > { %v432_v28 = vpop.permute.xlu0 %431  ;;  %v442_v38 = vpop.permute.xlu1 %441 }
  0x97   : > { %v470_v24 = vpop.f32.mrf.mxu0 }
  0x98   : > { %v525_v25 = vpop.f32.mrf.mxu1  ;;  %v471_v30 = vadd.f32 %v470_v24, %v427_v22 }
  0x99   : > { %v526_v34 = vadd.f32 %v525_v25, %v501_v23 }
  0x9d   : > { %v475_v27 = vpop.f32.mrf.mxu2 }
  0x9e   : > { %v476_v40 = vadd.f32 %v475_v27, %v437_v26 }
  0x9f   : > { %v472_v29 = vpop.f32.mrf.mxu0 }
  0xa0   : > { %v473_v32 = vadd.f32 %v472_v29, %v432_v28  ;;  %v527_v33 = vpop.f32.mrf.mxu1 }
  0xa1   : > { %v528_v35 = vadd.f32 %v527_v33, %v506_v31 }
  0xa2   : > { %v772_v36 = vpack.c.bf16 %v473_v32, %v471_v30 }
  0xa3   : > { %v782_v37 = vpack.c.bf16 %v528_v35, %v526_v34 }
  0xa4   : > { %773 = vst [vmem:[%s392_s19] sm:$0xff] %v772_v36  }
  0xa5   : > { %783 = vst [vmem:[%s408_s22] sm:$0xff] %v782_v37   ;;  %v477_v39 = vpop.f32.mrf.mxu2 }
  0xa6   : > { %v478_v41 = vadd.f32 %v477_v39, %v442_v38 }
  0xa8   : > { %v777_v42 = vpack.c.bf16 %v478_v41, %v476_v40 }
  0xaa   : > { %778 = vst [vmem:[%s400_s24] sm:$0xff] %v777_v42  }
  0xab PF: > { %s19_s29 = sadd.s32 1, %s836_s29   ;;  %s966_s27 = smov %s832_s28 }
  0xac   : > { %p16_p5 = scmp.ge.s32.totalorder %s19_s29, 4   ;;  %s967_s28 = smov %s969_s30 }
  0xae   :  { %18 = sbr.rel (!%p16_p5) target bundleno = 2 (0x2), region = 101 }

// kernel: ltcontext_attention.3
= control target key start
LH: loop header
LB: loop body
LE: loop exit
PB: predicated region body
PF: predicated region fallthrough
CT: control target
= control target key end

     0   :  { %s972_s21 = smov 0   ;;  %s974_s22 = smov 0   ;;  %s1072_s0 = inlined_call_operand.vmem [shape: bf16[8,2,8,5], index: 0, kind: input, shape index: {}]   ;;  %s1073_s1 = inlined_call_operand.vmem [shape: bf16[8,2,8,5], index: 1, kind: input, shape index: {}]   ;;  %s1074_s2 = inlined_call_operand.vmem [shape: bf16[8,2,8,5], index: 2, kind: input, shape index: {}]   ;;  %s1075_s3 = inlined_call_operand.vmem [shape: f32[8,5,2], index: 3, kind: input, shape index: {}]   ;;  %s1076_s4 = inlined_call_operand.vmem [shape: bf16[32,16], index: 4, kind: input, shape index: {}]   ;;  %s1077_s5 = inlined_call_operand.vmem [shape: f32[32,1], index: 5, kind: input, shape index: {}]   ;;  %s1078_s6 = inlined_call_operand.vmem [shape: f32[8,32,5], index: 6, kind: output, shape index: {}]  }
   0x1   :  { %s976_s23 = smov 0  }
   0x2 LB: > { %s28_s24 = sadd.s32 1, %s927_s22  ;;  %p824_p0 = scmp.ge.s32.totalorder %s931_s23, 1  ;;  %s931_s23 = sphi %s976_s23, %s16_s23   ;;  %s927_s22 = sphi %s974_s22, %s1080_s22   ;;  %s923_s21 = sphi %s972_s21, %s1079_s21  }
   0x3   : > { %p30_p1 = scmp.ge.s32.totalorder %s28_s24, 8  ;;  %p260_p2 = scmp.lt.s32.totalorder %s931_s23, 9 }
   0x5   : > { %s1082_s24 = smov (%p30_p1, %s28_s24), 0  ;;  %p261_p3 = pnand %p824_p0, %p260_p2 }
   0x6   : > { %p310_p4 = scmp.lt.s32.totalorder (!%p261_p3), %s923_s21, 7 }
   0x7   : > { %264 = sbr.rel (%p261_p3) target bundleno = 711 (0x2c7), region = 44 }
   0xc   : > { %s1084_s21 = smov (!%p310_p4, %s923_s21), 7  ;;  %vm370_vm0 = vcmask 1043456   ;;  %vm532_vm1 = vcmask 12296   ;;  %vm430_vm2 = vcmask 4096   ;;  %v933_v5 = vmov 1   ;;  %v637_v19 = vld [vmem:[%s1077_s5] sm:$0xff] }
   0xd   : > { %s993_s25 = sshll.u32 %s1084_s21, 3  ;;  %887 = vset.pattern.permute.xlu1 %v933_v5  ;;  %v934_v9 = vmov 0   ;;  %v640_v26 = vld [vmem:[%s1077_s5 + $0x18] sm:$0xff]  ;;  %vm366_vm5 = vcmask 64512   ;;  %vm387_vm6 = vcmask 36864   ;;  %vm410_vm7 = vcmask 1041408  }
   0xe   : > { %s322_s28 = scalar_lea.vmem %s1073_s1, %s993_s25  ;;  %s317_s7 = scalar_lea.vmem %s1072_s0, %s993_s25  ;;  %889 = vset.pattern.permute.xlu2 %v934_v9  ;;  %vm411_vm8 = vcmask 1042432   ;;  %v935_v53 = vmov 65535   ;;  %vm406_vm9 = vcmask 39936  }
   0xf   : > { %v837_v0 = vld [vmem:[%s322_s28 + $0x4] sm:$0xf]  ;;  %v342_v3 = vld [vmem:[%s322_s28] sm:$0xf]  ;;  %s331_s10 = scalar_lea.vmem %s1075_s3, %s993_s25  ;;  %v412_v54 = vsel %vm410_vm7, 4294967295, %v935_v53  ;;  %s327_s17 = scalar_lea.vmem %s1074_s2, %s993_s25 }
  0x10   : > { %v836_v1 = vld [vmem:[%s317_s7 + $0x4] sm:$0xf]  ;;  %460 = vxpose.xlu0.c.b16.start.end [1/1] (short) (narrow) %v837_v0, 16  ;;  %v341_v8 = vld [vmem:[%s317_s7] sm:$0xf]  ;;  %v413_v58 = vsel %vm411_vm8, %v412_v54, 0 }
  0x11   : > { %v480_v2 = vsel %vm370_vm0, %v836_v1, 0  ;;  %v454_v4 = vld [vmem:[%s331_s10] sm:$0x1f]  ;;  %v372_v11 = vsel %vm370_vm0, %v341_v8, 0  ;;  %s856_s30 = sshll.u32 %s1084_s21, 5 }
  0x12   : > { %489 = vmatpush.bf16.msra.mxu2 %v480_v2  ;;  %v533_v6 = vsel %vm532_vm1, %v454_v4, -inf  ;;  %v344_v7 = vld [vmem:[%s331_s10] sm:$0x1f]  ;;  %457 = vperm.xlu1 %887, %v454_v4   ;;  %s339_s9 = scalar_lea.vmem %s1078_s6, %s856_s30 }
  0x13   : > { %v431_v10 = vsel %vm430_vm2, %v344_v7, -inf  ;;  %v534_v12 = vrot.slane %v533_v6, 4  ;;  %381 = vmatpush.bf16.msra.mxu1 %v372_v11  ;;  %v838_v63 = vld [vmem:[%s327_s17 + $0x4] sm:$0xf]  ;;  %v343_v4 = vld [vmem:[%s327_s17] sm:$0xf] }
  0x14   : > { %v432_v13 = vrot.slane %v431_v10, 4 }
  0x15   : > { %v535_v14 = vmax.f32 %v533_v6, %v534_v12 }
  0x16   : > { %v433_v15 = vmax.f32 %v431_v10, %v432_v13 }
  0x17   : > { %v536_v16 = vrot.slane %v535_v14, 2 }
  0x18   : > { %v434_v17 = vrot.slane %v433_v15, 2 }
  0x19   : > { %v537_v18 = vmax.f32 %v535_v14, %v536_v16 }
  0x1a   : > { %888 = vset.pattern.permute.xlu1 %v934_v9  ;;  %v435_v20 = vmax.f32 %v433_v15, %v434_v17 }
  0x1b   : > { %347 = vperm.xlu1 %888, %v344_v7   ;;  %v538_v22 = vrot.slane %v537_v18, 1 }
  0x1c   : > { %v436_v21 = vrot.slane %v435_v20, 1 }
  0x1d   : > { %v539_v25 = vmax.f32 %v537_v18, %v538_v22 }
  0x1e   : > { %v437_v23 = vmax.f32 %v435_v20, %v436_v21 }
  0x1f   : > { %vm540_vm4 = vcmp.gt.f32.partialorder %v539_v25, -1.0 }
  0x20   : > { %350 = vxpose.xlu0.c.b16.start.end [1/1] (short) (narrow) %v342_v3, 16  ;;  %vm438_vm3 = vcmp.gt.f32.partialorder %v437_v23, -1.0  ;;  %v542_v27 = vsel %vm540_vm4, 1, %v934_v9 }
  0x21   : > { %v440_v24 = vsel %vm438_vm3, 1, %v934_v9 }
  0x22   : > { %442 = vperm.xlu2 %889, %v440_v24  }
  0x23   : > { %643 = vperm.xlu1 %888, %v637_v19  }
  0x2a   : > { %890 = vset.pattern.permute.xlu2 %v933_v5 }
  0x2b   : > { %658 = vperm.xlu1 %888, %v640_v26   ;;  %544 = vperm.xlu2 %890, %v542_v27  }
  0x33   : > { %891 = vset.pattern.permute.xlu2 %v934_v9 }
  0x7c   : > { %v443_v14 = vpop.permute.xlu2 %442 }
  0x7d   : > { %vm444_vm11 = vcmp.eq.s32.totalorder %v443_v14, 1 }
  0x84   : > { %v458_v30 = vpop.permute.xlu1 %457 }
  0x85   : > { %v545_v18 = vpop.permute.xlu2 %544 }
  0x86   : > { %vm546_vm10 = vcmp.eq.s32.totalorder %v545_v18, 1 }
  0x87   : > { %892 = vset.pattern.permute.xlu0 %v934_v9 }
  0x8d   : > { %v348_v38 = vpop.permute.xlu1 %347 }
  0xbc   : > { %v468_v28 = vpop.trf.xlu0 }
  0xbd   : > { %839 = vmatmul.msk.bf16.vlgmr.msra.gmra.mxu2 %vm366_vm5, %v468_v28 }
  0xcc   : > { %v358_v29 = vpop.trf.xlu0 }
  0xcd   : > { %834 = vmatmul.msk.bf16.vlgmr.msra.gmra.mxu1 %vm366_vm5, %v358_v29 }
 0x140   : > { %v491_v31 = vpop.f32.mrf.mxu2 }
 0x141   : > { %v492_v32 = vadd.f32 %v491_v31, %v458_v30 }
 0x143   : > { %v495_v33 = vsel %vm387_vm6, %v492_v32, -inf }
 0x144   : > { %v496_v34 = vrot.slane %v495_v33, 4 }
 0x146   : > { %v497_v35 = vmax.f32 %v495_v33, %v496_v34 }
 0x148   : > { %v498_v36 = vrot.slane %v497_v35, 2  ;;  %v493_v37 = vpop.f32.mrf.mxu2 }
 0x14a   : > { %v499_v39 = vmax.f32 %v497_v35, %v498_v36  ;;  %v383_v40 = vpop.f32.mrf.mxu1 }
 0x14b   : > { %v384_v41 = vadd.f32 %v383_v40, %v348_v38 }
 0x14c   : > { %v500_v42 = vrot.slane %v499_v39, 1 }
 0x14d   : > { %v388_v43 = vsel %vm387_vm6, %v384_v41, -inf }
 0x14e   : > { %v501_v44 = vmax.f32 %v499_v39, %v500_v42  ;;  %v389_v45 = vrot.slane %v388_v43, 4 }
 0x150   : > { %v502_v46 = vsub.f32 %v492_v32, %v501_v44  ;;  %v390_v47 = vmax.f32 %v388_v43, %v389_v45 }
 0x152   : > { %v503_v48 = vmul.f32 1.442695, %v502_v46  ;;  %v391_v49 = vrot.slane %v390_v47, 2  ;;  %v385_v50 = vpop.f32.mrf.mxu1 }
 0x154   : > { %893 = vpow2.f32 %v503_v48  ;;  %v392_v51 = vmax.f32 %v390_v47, %v391_v49 }
 0x156   : > { %v393_v52 = vrot.slane %v392_v51, 1 }
 0x158   : > { %v394_v55 = vmax.f32 %v392_v51, %v393_v52 }
 0x15a   : > { %v894_v56 = vpop.eup %893  ;;  %v395_v57 = vsub.f32 %v384_v41, %v394_v55 }
 0x15b   : > { %v505_v59 = vsel %vm387_vm6, %v894_v56, 0.0  ;;  %v512_v60 = vpack.c.bf16 %v894_v56, %v894_v56 }
 0x15c   : > { %v396_v61 = vmul.f32 1.442695, %v395_v57  ;;  %v506_v5 = vrot.slane %v505_v59, 4 }
 0x15d   : > { %v517_v62 = vand.u32 %v512_v60, %v413_v58 }
 0x15e   : > { %895 = vpow2.f32 %v396_v61  ;;  %v507_v6 = vadd.f32 %v506_v5, %v505_v59 }
 0x15f   : > { %526 = vmatpush.bf16.msra.mxu3 %v517_v62 }
 0x160   : > { %v508_v9 = vrot.slane %v507_v6, 2 }
 0x162   : > { %840 = vmatmul.msk.bf16.vlgmr.msra.gmra.mxu3 %vm406_vm9, %v838_v63  ;;  %v509_v10 = vadd.f32 %v508_v9, %v507_v6 }
 0x164   : > { %v896_v0 = vpop.eup %895  ;;  %v510_v12 = vrot.slane %v509_v10, 1 }
 0x165   : > { %v398_v1 = vsel %vm387_vm6, %v896_v0, 0.0  ;;  %v405_v2 = vpack.c.bf16 %v896_v0, %v896_v0  ;;  %vm671_vm6 = vcmask 130048  }
 0x166   : > { %v399_v7 = vrot.slane %v398_v1, 4  ;;  %v511_v15 = vadd.f32 %v510_v12, %v509_v10 }
 0x167   : > { %v415_v3 = vand.u32 %v413_v58, %v405_v2 }
 0x168   : > { %v400_v8 = vadd.f32 %v399_v7, %v398_v1  ;;  %897 = vrcp.f32 %v511_v15 }
 0x169   : > { %424 = vmatpush.bf16.msrb.mxu1 %v415_v3 }
 0x16a   : > { %v401_v11 = vrot.slane %v400_v8, 2 }
 0x16c   : > { %835 = vmatmul.msk.bf16.vlgmr.msrb.gmra.mxu1 %vm406_vm9, %v343_v4  ;;  %v402_v13 = vadd.f32 %v401_v11, %v400_v8 }
 0x16e   : > { %v403_v16 = vrot.slane %v402_v13, 1  ;;  %v898_v19 = vpop.eup %897 }
 0x16f   : > { %v547_v21 = vsel %vm546_vm10, %v898_v19, 0.0 }
 0x170   : > { %v404_v17 = vadd.f32 %v403_v16, %v402_v13 }
 0x172   : > { %899 = vrcp.f32 %v404_v17 }
 0x178   : > { %v900_v22 = vpop.eup %899 }
 0x179   : > { %v445_v25 = vsel %vm444_vm11, %v900_v22, 0.0 }
 0x1e5   : > { %v528_v20 = vpop.f32.mrf.mxu3 }
 0x1e6   : > { %v548_v23 = vmul.f32 %v547_v21, %v528_v20 }
 0x1e8   : > { %549 = vst.msk [vmem:[#allocation2 + $0x8] sm:$0xff] %vm406_vm9, %v548_v23  ;;  %v936_v23 = vmov -1.0  }
 0x1e9   : > { %v426_v24 = vpop.f32.mrf.mxu1 }
 0x1ea   : > { %v446_v26 = vmul.f32 %v445_v25, %v426_v24  ;;  %v639_v25 = vld [vmem:[%s1077_s5 + $0x10] sm:$0xff] }
 0x1eb   : > { %653 = vperm.xlu0 %892, %v639_v25  }
 0x1ec   : > { %447 = vst.msk [vmem:[#allocation2] sm:$0xff] %vm406_vm9, %v446_v26  ;;  %v638_v26 = vld [vmem:[%s1077_s5 + $0x8] sm:$0xff] }
 0x1ed   : > { %v530_v27 = vpop.f32.mrf.mxu3  ;;  %648 = vperm.xlu2 %891, %v638_v26  }
 0x1ef   : > { %v1027_v28 = vld [vmem:[#allocation2 + $0x8] sm:$0xff] }
 0x1f0   : > { %v1030_v29 = vmul.f32 0.70710677, %v1027_v28 }
 0x1f1   : > { %v428_v30 = vpop.f32.mrf.mxu1 }
 0x1f2   : > { %v561_v31 = vand.u32 2147483647, %v1030_v29  ;;  %vm557_vm4 = vcmp.ge.f32.partialorder %v1030_v29, 0.0 }
 0x1f3   : > { %v1033_v32 = vld [vmem:[#allocation2] sm:$0xff]  ;;  %v559_v24 = vsel %vm557_vm4, 1.0, %v936_v23 }
 0x1f4   : > { %v1036_v33 = vmul.f32 0.70710677, %v1033_v32  ;;  %v563_v34 = vmul.f32 0.3275911, %v561_v31  ;;  %v615_v55 = vsub.f32 0.0, %v561_v31 }
 0x1f6   : > { %v560_v35 = vand.u32 2147483647, %v1036_v33  ;;  %v565_v36 = vadd.f32 1.0, %v563_v34  ;;  %v617_v63 = vmul.f32 %v615_v55, %v561_v31  ;;  %vm556_vm5 = vcmp.ge.f32.partialorder %v1036_v33, 0.0  ;;  %v857_v33 = vld [vmem:[%s1076_s4] sm:$0xff] }
 0x1f7   : > { %v558_v31 = vsel %vm556_vm5, 1.0, %v936_v23 }
 0x1f8   : > { %v562_v37 = vmul.f32 0.3275911, %v560_v35  ;;  %901 = vrcp.f32 %v565_v36  ;;  %v590_v43 = vand.u32 2147483647, %v565_v36  ;;  %v592_v44 = vand.u32 2147483648, %v565_v36 }
 0x1f9   : > { %vm586_vm13 = vweird.f32 %v565_v36  ;;  %v614_v62 = vsub.f32 0.0, %v560_v35  ;;  %v620_v5 = vmul.f32 1.442695, %v617_v63 }
 0x1fa   : > { %v564_v38 = vadd.f32 1.0, %v562_v37  ;;  %vm591_vm15 = vcmp.eq.f32.partialorder %v590_v43, 8.507059e+37  ;;  %v593_v50 = vor.u32 1.1754944e-38, %v592_v44  ;;  %v553_v37 = vmul.f32 0.5, %v1027_v28 }
 0x1fb   : > { %v616_v4 = vmul.f32 %v614_v62, %v560_v35 }
 0x1fc   : > { %903 = vrcp.f32 %v564_v38  ;;  %v577_v49 = vand.u32 2147483648, %v564_v38  ;;  %v575_v52 = vand.u32 2147483647, %v564_v38  ;;  %vm571_vm1 = vweird.f32 %v564_v38 }
 0x1fd   : > { %v618_v10 = vmul.f32 1.442695, %v616_v4  ;;  %905 = vpow2.f32 %v620_v5 }
 0x1fe   : > { %v902_v39 = vpop.eup %901  ;;  %v578_v58 = vor.u32 1.1754944e-38, %v577_v49  ;;  %vm576_vm3 = vcmp.eq.f32.partialorder %v575_v52, 8.507059e+37 }
 0x1ff   : > { %v582_v40 = vmul.f32 %v902_v39, %v565_v36  ;;  %vm587_vm12 = vweird.f32 %v902_v39  ;;  %907 = vpow2.f32 %v618_v10  ;;  %v552_v36 = vmul.f32 0.5, %v1033_v32  ;;  %v644_v32 = vpop.permute.xlu1 %643 }
 0x200   : > { %vm588_vm14 = vmor %vm586_vm13, %vm587_vm12 }
 0x201   : > { %v583_v41 = vsub.f32 1.0, %v582_v40 }
 0x202   : > { %v904_v42 = vpop.eup %903 }
 0x203   : > { %v567_v45 = vmul.f32 %v904_v42, %v564_v38  ;;  %v584_v46 = vmul.f32 %v902_v39, %v583_v41  ;;  %vm572_vm0 = vweird.f32 %v904_v42  ;;  %v906_v17 = vpop.eup %905 }
 0x204   : > { %vm573_vm2 = vmor %vm571_vm1, %vm572_vm0 }
 0x205   : > { %v568_v47 = vsub.f32 1.0, %v567_v45  ;;  %v585_v48 = vadd.f32 %v902_v39, %v584_v46  ;;  %v908_v22 = vpop.eup %907 }
 0x207   : > { %v569_v51 = vmul.f32 %v904_v42, %v568_v47  ;;  %v589_v53 = vsel %vm588_vm14, %v902_v39, %v585_v48 }
 0x208   : > { %v594_v54 = vsel %vm591_vm15, %v593_v50, %v589_v53  ;;  %v659_v50 = vpop.permute.xlu1 %658 }
 0x209   : > { %v570_v56 = vadd.f32 %v904_v42, %v569_v51  ;;  %v597_v57 = vmul.f32 1.0614054, %v594_v54 }
 0x20b   : > { %v574_v59 = vsel %vm573_vm2, %v904_v42, %v570_v56  ;;  %v599_v60 = vadd.f32 -1.4531521, %v597_v57  ;;  %v858_v42 = vld [vmem:[%s1076_s4 + $0x8] sm:$0xff] }
 0x20c   : > { %v579_v61 = vsel %vm576_vm3, %v578_v58, %v574_v59 }
 0x20d   : > { %v596_v0 = vmul.f32 1.0614054, %v579_v61  ;;  %v601_v1 = vmul.f32 %v599_v60, %v594_v54 }
 0x20f   : > { %v598_v2 = vadd.f32 -1.4531521, %v596_v0  ;;  %v603_v3 = vadd.f32 1.4214138, %v601_v1 }
 0x211   : > { %v600_v6 = vmul.f32 %v598_v2, %v579_v61  ;;  %v605_v7 = vmul.f32 %v603_v3, %v594_v54 }
 0x213   : > { %v602_v8 = vadd.f32 1.4214138, %v600_v6  ;;  %v607_v9 = vadd.f32 -0.28449672, %v605_v7 }
 0x215   : > { %v604_v11 = vmul.f32 %v602_v8, %v579_v61  ;;  %v609_v12 = vmul.f32 %v607_v9, %v594_v54 }
 0x217   : > { %v606_v13 = vadd.f32 -0.28449672, %v604_v11  ;;  %v611_v14 = vadd.f32 0.2548296, %v609_v12 }
 0x219   : > { %v608_v15 = vmul.f32 %v606_v13, %v579_v61  ;;  %v613_v16 = vmul.f32 %v611_v14, %v594_v54 }
 0x21b   : > { %v610_v18 = vadd.f32 0.2548296, %v608_v15  ;;  %v623_v19 = vmul.f32 %v906_v17, %v613_v16 }
 0x21d   : > { %v612_v20 = vmul.f32 %v610_v18, %v579_v61  ;;  %v625_v21 = vsub.f32 1.0, %v623_v19 }
 0x21f   : > { %v622_v27 = vmul.f32 %v908_v22, %v612_v20  ;;  %v627_v30 = vmul.f32 %v625_v21, %v559_v24 }
 0x221   : > { %v624_v29 = vsub.f32 1.0, %v622_v27  ;;  %v629_v35 = vadd.f32 1.0, %v627_v30 }
 0x223   : > { %v626_v34 = vmul.f32 %v624_v29, %v558_v31  ;;  %v631_v40 = vmul.f32 %v629_v35, %v553_v37 }
 0x225   : > { %v628_v38 = vadd.f32 1.0, %v626_v34 }
 0x227   : > { %v630_v39 = vmul.f32 %v628_v38, %v552_v36 }
 0x229   : > { %v636_v41 = vpack.c.bf16 %v631_v40, %v630_v39 }
 0x22b   : > { %685 = vmatpush.bf16.msra.mxu0 %v636_v41 }
 0x22e   : > { %849 = vmatmul.msk.bf16.vlgmr.msra.gmra.mxu0 %vm671_vm6, %v857_v33 }
 0x23e   : > { %850 = vmatmul.msk.bf16.gmra.mxu0 %vm671_vm6, %v858_v42 }
 0x247   : > { %v649_v44 = vpop.permute.xlu2 %648 }
 0x25d   : > { %v654_v47 = vpop.permute.xlu0 %653 }
 0x2ab   : > { %v687_v28 = vpop.f32.mrf.mxu0 }
 0x2ac   : > { %v688_v43 = vadd.f32 %v687_v28, %v644_v32 }
 0x2ae   : > { %697 = vst.msk [vmem:[%s339_s9] sm:$0xff] %vm406_vm9, %v688_v43 }
 0x2b3   : > { %v689_v45 = vpop.f32.mrf.mxu0 }
 0x2b4   : > { %v690_v46 = vadd.f32 %v689_v45, %v649_v44 }
 0x2b6   : > { %698 = vst.msk [vmem:[%s339_s9 + $0x8] sm:$0xff] %vm406_vm9, %v690_v46 }
 0x2bb   : > { %v692_v48 = vpop.f32.mrf.mxu0 }
 0x2bc   : > { %v693_v49 = vadd.f32 %v692_v48, %v654_v47 }
 0x2be   : > { %699 = vst.msk [vmem:[%s339_s9 + $0x10] sm:$0xff] %vm406_vm9, %v693_v49 }
 0x2c3   : > { %v694_v51 = vpop.f32.mrf.mxu0 }
 0x2c4   : > { %v695_v52 = vadd.f32 %v694_v51, %v659_v50 }
 0x2c6   : > { %700 = vst.msk [vmem:[%s339_s9 + $0x18] sm:$0xff] %vm406_vm9, %v695_v52 }
 0x2c7 PF: > { %s16_s23 = sadd.s32 1, %s931_s23   ;;  %s1079_s21 = smov %s927_s22 }
 0x2c8   : > { %p13_p5 = scmp.ge.s32.totalorder %s16_s23, 10   ;;  %s1080_s22 = smov %s1082_s24 }
 0x2ca   :  { %15 = sbr.rel (!%p13_p5) target bundleno = 2 (0x2), region = 86 }

</bundles_post_ra>
